<compile_context>
chip_gen: v6e
topology: v6e:2x2x1
jax: 0.10.0
libtpu: 0.0.40
codegen_flags: <defaults>
</compile_context>

<pallas_src>
import numpy as np
import jax
import jax.numpy as jnp
from jax.experimental import pallas as pl
from jax.experimental.pallas import tpu as pltpu


# ----------------------------- schedule (numpy, as in the PyTorch module) ----

def cosine_beta_schedule(timesteps, s=0.008):
    steps = timesteps + 1
    x = np.linspace(0, steps, steps)
    alphas_cumprod = np.cos((x / steps + s) / (1 + s) * np.pi * 0.5) ** 2
    alphas_cumprod = alphas_cumprod / alphas_cumprod[0]
    betas = 1 - alphas_cumprod[1:] / alphas_cumprod[:-1]
    return np.clip(betas, a_min=0, a_max=0.999)


def make_schedule(timesteps):
    betas = cosine_beta_schedule(timesteps)
    alphas = 1.0 - betas
    alphas_cumprod = np.cumprod(alphas, axis=0)
    return dict(
        sqrt_alphas_cumprod=jnp.asarray(np.sqrt(alphas_cumprod), jnp.float32),
        sqrt_one_minus_alphas_cumprod=jnp.asarray(
            np.sqrt(1.0 - alphas_cumprod), jnp.float32),
        extra_term_coef1=jnp.asarray(
            (1 - np.sqrt(alphas_cumprod)) / np.sqrt(1 - alphas_cumprod), jnp.float32),
    )


# ----------------------------- fused Pallas kernel ---------------------------
#
# Block shapes per grid step (b, s):
#   x / noise / center / cond / pred / noise_mod : (1, C, T)   T = tile_hw (lane axis)
#   coef  : (B, 4) resident in SMEM, read as scalars
#           [extra_term_coef1[t], (t>=0), sqrt(a_bar), sqrt(1-a_bar)]
#   bias  : (1, hidden, 1)    per-batch conv1 bias (time-emb + feats projection)
#   w1    : (hidden, 2C)      conv1 weight [w1a^T | w1b^T]   (resident const block)
#   w2t   : (C, hidden)       conv2 weight, pre-transposed   (resident const block)
#   b2    : (C, 1)

def diffusion_fwd_kernel(coef_ref, x_ref, noise_ref, center_ref, cond_ref,
                         bias_ref, w1_ref, w2t_ref, b2_ref,
                         pred_ref, noisemod_ref):
    b = pl.program_id(0)

    # per-batch diffusion scalars from SMEM
    extra1 = coef_ref[b, 0]     # extra_term_coef1[t]
    tcond = coef_ref[b, 1]      # (t >= 0)
    sa = coef_ref[b, 2]         # sqrt_alphas_cumprod[t]
    s1a = coef_ref[b, 3]        # sqrt_one_minus_alphas_cumprod[t]

    x = x_ref[0]                # (C, T)   x_start in [-1, 1]
    n = noise_ref[0]            # (C, T)
    ctr = center_ref[0]         # (C, T)   center in [0, 1]
    cnd = cond_ref[0]           # (C, T)   cond

    # --- q_sample (use_center=True): noise += coef1 * normalize_to_neg_one_to_one(center)
    n_mod = n + extra1 * (2.0 * ctr - 1.0)
    x_t = (sa * x + s1a * n_mod) * tcond + x * (1.0 - tcond)
    noisemod_ref[0] = n_mod     # PyTorch `noise +=` is in-place -> returned noise is modified

    # --- synthetic UNet on the MXU:
    #     h = W1a @ x_t + W1b @ cond + bias ; out = W2^T @ relu(h) + b2
    w1 = w1_ref[...]            # (hidden, 2C)
    C = x.shape[0]
    h = (jnp.dot(w1[:, :C], x_t, preferred_element_type=jnp.float32)
         + jnp.dot(w1[:, C:], cnd, preferred_element_type=jnp.float32)
         + bias_ref[0])                                     # (hidden, T) + (hidden, 1)
    h = jnp.maximum(h, 0.0)
    pred_ref[0] = (jnp.dot(w2t_ref[...], h, preferred_element_type=jnp.float32)
                   + b2_ref[...])                           # (C, T) + (C, 1)


def _pick_tile_hw(HW, cap=16384):
    """Largest multiple-of-128 divisor of HW that is <= cap (or full extent)."""
    if HW <= cap:
        return HW
    t = (cap // 128) * 128
    while t >= 128:
        if HW % t == 0:
            return t
        t -= 128
    return HW


def enlight_diffusion_forward(x_start, t, cond, center, feats_cond, noise,
                              schedule, params, *, tile_hw=None):
    """x_start/cond/center/noise: NCHW float32; t: (B,) int32; feats_cond: (B,F)."""
    B, C, H, W = x_start.shape
    hidden = params["w2"].shape[0]
    HW = H * W

    if tile_hw is None:
        tile_hw = _pick_tile_hw(HW)
    assert HW % tile_hw == 0 and (tile_hw % 128 == 0 or tile_hw == HW), \
        "tile_hw must divide H*W and be a multiple of 128 (or the full extent)"

    # pure reshape (no transpose) — NCHW stays HBM-contiguous, spatial axis on lanes
    to_rows = lambda a: a.reshape(B, C, HW)
    x_r, n_r, c_r, cd_r = map(to_rows, (x_start, noise, center, cond))

    # per-batch diffusion coefficients (extract(...) in PyTorch) — tiny (B,4) SMEM table
    t = t.astype(jnp.int32)
    t_clamped = jnp.maximum(t, 0)
    coef_b = jnp.stack([
        schedule["extra_term_coef1"][t_clamped],
        (t >= 0).astype(jnp.float32),
        schedule["sqrt_alphas_cumprod"][t_clamped],
        schedule["sqrt_one_minus_alphas_cumprod"][t_clamped],
    ], axis=-1)                                                    # (B, 4)

    # time embedding + feats projection -> per-batch bias for the first conv (B, hidden, 1)
    half = hidden // 2
    freqs = jnp.exp(-jnp.log(10000.0) * jnp.arange(half, dtype=jnp.float32) / half)
    args = t_clamped.astype(jnp.float32)[:, None] * freqs[None, :]
    temb = jnp.concatenate([jnp.sin(args), jnp.cos(args)], axis=-1)            # (B, hidden)
    bias_b = (temb @ params["wt"] + feats_cond @ params["wf"] + params["b1"])  # (B, hidden)
    bias_b = bias_b.reshape(B, hidden, 1)

    # conv weights in MXU-friendly layout (host-side, tiny)
    w1_cat = jnp.concatenate([params["w1a"].T, params["w1b"].T], axis=1)  # (hidden, 2C)
    w2t = params["w2"].T                                                  # (C, hidden)
    b2c = params["b2"].reshape(C, 1)                                      # (C, 1)

    grid = (B, HW // tile_hw)
    img_spec = pl.BlockSpec((1, C, tile_hw), lambda b, s: (b, 0, s))
    const_spec = lambda shape: pl.BlockSpec(shape, lambda b, s: (0,) * len(shape))
    smem_spec = pl.BlockSpec(memory_space=pltpu.MemorySpace.SMEM)

    pred_r, noisemod_r = pl.pallas_call(
        diffusion_fwd_kernel,
        out_shape=(jax.ShapeDtypeStruct((B, C, HW), jnp.float32),
                   jax.ShapeDtypeStruct((B, C, HW), jnp.float32)),
        grid_spec=pltpu.PrefetchScalarGridSpec(
            num_scalar_prefetch=0,
            grid=grid,
            in_specs=[smem_spec,                                   # coef table (B, 4)
                      img_spec, img_spec, img_spec, img_spec,      # x, noise, center, cond
                      pl.BlockSpec((1, hidden, 1), lambda b, s: (b, 0, 0)),
                      const_spec((hidden, 2 * C)),                 # w1_cat
                      const_spec((C, hidden)),                     # w2^T
                      const_spec((C, 1))],                         # b2
            out_specs=[img_spec, img_spec],
        ),
        # noise input (arg 2) aliases the modified-noise output (PyTorch in-place `noise +=`)
        input_output_aliases={2: 1},
        compiler_params=pltpu.CompilerParams(
            dimension_semantics=("parallel", "parallel"),
            vmem_limit_bytes=32 * 1024 * 1024),
    )(coef_b, x_r, n_r, c_r, cd_r, bias_b, w1_cat, w2t, b2c)

    return pred_r.reshape(B, C, H, W), noisemod_r.reshape(B, C, H, W)


# ----------------------------- pure-JAX reference (for self-check) -----------

def reference_forward(x_start, t, cond, center, feats_cond, noise, schedule, params):
    B, C, H, W = x_start.shape
    hidden = params["w2"].shape[0]
    t_clamped = jnp.maximum(t, 0)
    ex = schedule["extra_term_coef1"][t_clamped][:, None, None, None]
    tc = (t >= 0).astype(jnp.float32)[:, None, None, None]
    sa = schedule["sqrt_alphas_cumprod"][t_clamped][:, None, None, None]
    s1a = schedule["sqrt_one_minus_alphas_cumprod"][t_clamped][:, None, None, None]
    n_mod = noise + ex * (2.0 * center - 1.0)
    x_t = (sa * x_start + s1a * n_mod) * tc + x_start * (1.0 - tc)

    half = hidden // 2
    freqs = jnp.exp(-jnp.log(10000.0) * jnp.arange(half, dtype=jnp.float32) / half)
    args = t_clamped.astype(jnp.float32)[:, None] * freqs[None, :]
    temb = jnp.concatenate([jnp.sin(args), jnp.cos(args)], axis=-1)
    bias_b = temb @ params["wt"] + feats_cond @ params["wf"] + params["b1"]

    xr = jnp.transpose(x_t, (0, 2, 3, 1))
    cr = jnp.transpose(cond, (0, 2, 3, 1))
    h = (xr @ params["w1a"] + cr @ params["w1b"] + bias_b[:, None, None, :])
    h = jnp.maximum(h, 0.0)
    out = h @ params["w2"] + params["b2"][0]
    return jnp.transpose(out, (0, 3, 1, 2)), n_mod


# ----------------------------- main -------------------------------------------

if __name__ == "__main__":
    B, C, H, W = 2, 4, 16, 16
    F_DIM, HIDDEN, TIMESTEPS = 8, 32, 100

    key = jax.random.PRNGKey(0)
    ks = jax.random.split(key, 12)

    # deterministic synthetic parameters (the real UNet is an external module)
    params = dict(
        w1a=(jax.random.normal(ks[0], (C, HIDDEN), jnp.float32) * 0.1),
        w1b=(jax.random.normal(ks[1], (C, HIDDEN), jnp.float32) * 0.1),
        w2=(jax.random.normal(ks[2], (HIDDEN, C), jnp.float32) * 0.1),
        b2=(jax.random.normal(ks[3], (1, C), jnp.float32) * 0.01),
        wt=(jax.random.normal(ks[4], (HIDDEN, HIDDEN), jnp.float32) * 0.1),
        wf=(jax.random.normal(ks[5], (F_DIM, HIDDEN), jnp.float32) * 0.1),
        b1=(jax.random.normal(ks[6], (HIDDEN,), jnp.float32) * 0.01),
    )
    schedule = make_schedule(TIMESTEPS)

    # inputs: x_start/noise in [-1,1]-ish, cond/center in [0,1]
    x_start = jax.random.uniform(ks[7], (B, C, H, W), jnp.float32, -1.0, 1.0)
    cond = jax.random.uniform(ks[8], (B, C, H, W), jnp.float32, 0.0, 1.0)
    center = jax.random.uniform(ks[9], (B, C, H, W), jnp.float32, 0.0, 1.0)
    noise = jax.random.normal(ks[10], (B, C, H, W), jnp.float32)
    feats_cond = jax.random.normal(ks[11], (B, F_DIM), jnp.float32)
    t = jnp.array([5, 42], dtype=jnp.int32)

    noise_pred, noise_out = jax.jit(
        lambda *a: enlight_diffusion_forward(*a, schedule=schedule, params=params)
    )(x_start, t, cond, center, feats_cond, noise)
    jax.block_until_ready((noise_pred, noise_out))

    ref_pred, ref_noise = reference_forward(
        x_start, t, cond, center, feats_cond, noise, schedule, params)
    assert np.allclose(np.asarray(noise_pred), np.asarray(ref_pred), atol=1e-3, rtol=1e-3)
    assert np.allclose(np.asarray(noise_out), np.asarray(ref_noise), atol=1e-5, rtol=1e-5)

    # TODO(synk): p_sample_loop / DDPM sampling loop (inference path) not implemented here;
    # only the training forward (q_sample + unet) is kernelized.
    print("KERNEL_OK")
</pallas_src>

<mosaic_0001>
module attributes {stable_mosaic.version = 11 : i64} {
  func.func @diffusion_fwd_kernel(%arg0: i32, %arg1: i32, %arg2: memref<2x4xf32, #tpu.memory_space<smem>>, %arg3: memref<1x4x256xf32, #tpu.memory_space<vmem>>, %arg4: memref<1x4x256xf32, #tpu.memory_space<vmem>>, %arg5: memref<1x4x256xf32, #tpu.memory_space<vmem>>, %arg6: memref<1x4x256xf32, #tpu.memory_space<vmem>>, %arg7: memref<1x32x1xf32, #tpu.memory_space<vmem>>, %arg8: memref<32x8xf32, #tpu.memory_space<vmem>>, %arg9: memref<4x32xf32, #tpu.memory_space<vmem>>, %arg10: memref<4x1xf32, #tpu.memory_space<vmem>>, %arg11: memref<1x4x256xf32, #tpu.memory_space<vmem>>, %arg12: memref<1x4x256xf32, #tpu.memory_space<vmem>>) attributes {dimension_semantics = [#tpu.dimension_semantics<parallel>, #tpu.dimension_semantics<parallel>], iteration_bounds = array<i64: 2, 1>, scalar_prefetch = 0 : i64, scratch_operands = 0 : i64, tpu.core_type = #tpu.core_type<tc>, window_params = [{transform_indices = @transform_0, window_bounds = array<i64: 2, 4>}, {transform_indices = @transform_1, window_bounds = array<i64: 1, 4, 256>}, {transform_indices = @transform_2, window_bounds = array<i64: 1, 4, 256>}, {transform_indices = @transform_3, window_bounds = array<i64: 1, 4, 256>}, {transform_indices = @transform_4, window_bounds = array<i64: 1, 4, 256>}, {transform_indices = @transform_5, window_bounds = array<i64: 1, 32, 1>}, {pipeline_mode = #tpu.pipeline_mode<synchronous>, transform_indices = @transform_6, window_bounds = array<i64: 32, 8>}, {pipeline_mode = #tpu.pipeline_mode<synchronous>, transform_indices = @transform_7, window_bounds = array<i64: 4, 32>}, {pipeline_mode = #tpu.pipeline_mode<synchronous>, transform_indices = @transform_8, window_bounds = array<i64: 4, 1>}, {transform_indices = @transform_9, window_bounds = array<i64: 1, 4, 256>}, {transform_indices = @transform_10, window_bounds = array<i64: 1, 4, 256>}]} {
    %0 = arith.index_cast %arg0 : i32 to index
    %c0 = arith.constant 0 : index
    %1 = memref.load %arg2[%0, %c0] : memref<2x4xf32, #tpu.memory_space<smem>>
    %2 = arith.index_cast %arg0 : i32 to index
    %c1 = arith.constant 1 : index
    %3 = memref.load %arg2[%2, %c1] : memref<2x4xf32, #tpu.memory_space<smem>>
    %4 = arith.index_cast %arg0 : i32 to index
    %c2 = arith.constant 2 : index
    %5 = memref.load %arg2[%4, %c2] : memref<2x4xf32, #tpu.memory_space<smem>>
    %6 = arith.index_cast %arg0 : i32 to index
    %c3 = arith.constant 3 : index
    %7 = memref.load %arg2[%6, %c3] : memref<2x4xf32, #tpu.memory_space<smem>>
    %c0_0 = arith.constant 0 : index
    %c0_1 = arith.constant 0 : index
    %c0_2 = arith.constant 0 : index
    %8 = vector.load %arg3[%c0_0, %c0_1, %c0_2] : memref<1x4x256xf32, #tpu.memory_space<vmem>>, vector<1x4x256xf32>
    %9 = vector.shape_cast %8 : vector<1x4x256xf32> to vector<4x256xf32>
    %c0_3 = arith.constant 0 : index
    %c0_4 = arith.constant 0 : index
    %c0_5 = arith.constant 0 : index
    %10 = vector.load %arg4[%c0_3, %c0_4, %c0_5] : memref<1x4x256xf32, #tpu.memory_space<vmem>>, vector<1x4x256xf32>
    %11 = vector.shape_cast %10 : vector<1x4x256xf32> to vector<4x256xf32>
    %c0_6 = arith.constant 0 : index
    %c0_7 = arith.constant 0 : index
    %c0_8 = arith.constant 0 : index
    %12 = vector.load %arg5[%c0_6, %c0_7, %c0_8] : memref<1x4x256xf32, #tpu.memory_space<vmem>>, vector<1x4x256xf32>
    %13 = vector.shape_cast %12 : vector<1x4x256xf32> to vector<4x256xf32>
    %c0_9 = arith.constant 0 : index
    %c0_10 = arith.constant 0 : index
    %c0_11 = arith.constant 0 : index
    %14 = vector.load %arg6[%c0_9, %c0_10, %c0_11] : memref<1x4x256xf32, #tpu.memory_space<vmem>>, vector<1x4x256xf32>
    %15 = vector.shape_cast %14 : vector<1x4x256xf32> to vector<4x256xf32>
    %cst = arith.constant 2.000000e+00 : f32
    %16 = vector.broadcast %cst : f32 to vector<4x256xf32>
    %17 = arith.mulf %16, %13 : vector<4x256xf32>
    %cst_12 = arith.constant 1.000000e+00 : f32
    %18 = vector.broadcast %cst_12 : f32 to vector<4x256xf32>
    %19 = arith.subf %17, %18 : vector<4x256xf32>
    %20 = vector.broadcast %1 : f32 to vector<4x256xf32>
    %21 = arith.mulf %20, %19 : vector<4x256xf32>
    %22 = arith.addf %11, %21 : vector<4x256xf32>
    %23 = vector.broadcast %5 : f32 to vector<4x256xf32>
    %24 = arith.mulf %23, %9 : vector<4x256xf32>
    %25 = vector.broadcast %7 : f32 to vector<4x256xf32>
    %26 = arith.mulf %25, %22 : vector<4x256xf32>
    %27 = arith.addf %24, %26 : vector<4x256xf32>
    %28 = vector.broadcast %3 : f32 to vector<4x256xf32>
    %29 = arith.mulf %27, %28 : vector<4x256xf32>
    %cst_13 = arith.constant 1.000000e+00 : f32
    %30 = arith.subf %cst_13, %3 : f32
    %31 = vector.broadcast %30 : f32 to vector<4x256xf32>
    %32 = arith.mulf %9, %31 : vector<4x256xf32>
    %33 = arith.addf %29, %32 : vector<4x256xf32>
    %c0_14 = arith.constant 0 : index
    %c0_15 = arith.constant 0 : index
    %c0_16 = arith.constant 0 : index
    %34 = vector.load %arg12[%c0_14, %c0_15, %c0_16] : memref<1x4x256xf32, #tpu.memory_space<vmem>>, vector<1x4x256xf32>
    %35 = vector.shape_cast %34 : vector<1x4x256xf32> to vector<4x256xf32>
    %36 = vector.shape_cast %22 : vector<4x256xf32> to vector<1x4x256xf32>
    tpu.vector_store %arg12[%c0_14, %c0_15, %c0_16], %36 {strides = array<i32>} : memref<1x4x256xf32, #tpu.memory_space<vmem>>, vector<1x4x256xf32>,
    %c0_17 = arith.constant 0 : index
    %c0_18 = arith.constant 0 : index
    %37 = vector.load %arg8[%c0_17, %c0_18] : memref<32x8xf32, #tpu.memory_space<vmem>>, vector<32x8xf32>
    %38 = vector.extract_strided_slice %37 {offsets = [0, 0], sizes = [32, 4], strides = [1, 1]} : vector<32x8xf32> to vector<32x4xf32>
    %cst_19 = arith.constant dense<0.000000e+00> : vector<32x256xf32>
    %39 = tpu.matmul %38, %33, %cst_19 {dimension_numbers = #tpu.dot_dimension_numbers<[1], [0], [0], [1], [0, 0, 1, 1], [], []>} : vector<32x4xf32>, vector<4x256xf32>, vector<32x256xf32> -> vector<32x256xf32>
    %40 = vector.extract_strided_slice %37 {offsets = [0, 4], sizes = [32, 4], strides = [1, 1]} : vector<32x8xf32> to vector<32x4xf32>
    %cst_20 = arith.constant dense<0.000000e+00> : vector<32x256xf32>
    %41 = tpu.matmul %40, %15, %cst_20 {dimension_numbers = #tpu.dot_dimension_numbers<[1], [0], [0], [1], [0, 0, 1, 1], [], []>} : vector<32x4xf32>, vector<4x256xf32>, vector<32x256xf32> -> vector<32x256xf32>
    %42 = arith.addf %39, %41 : vector<32x256xf32>
    %c0_21 = arith.constant 0 : index
    %c0_22 = arith.constant 0 : index
    %c0_23 = arith.constant 0 : index
    %43 = vector.load %arg7[%c0_21, %c0_22, %c0_23] : memref<1x32x1xf32, #tpu.memory_space<vmem>>, vector<1x32x1xf32>
    %44 = vector.shape_cast %43 : vector<1x32x1xf32> to vector<32x1xf32>
    %45 = vector.broadcast %44 : vector<32x1xf32> to vector<32x256xf32>
    %46 = arith.addf %42, %45 : vector<32x256xf32>
    %cst_24 = arith.constant 0.000000e+00 : f32
    %47 = vector.broadcast %cst_24 : f32 to vector<32x256xf32>
    %48 = arith.maximumf %46, %47 : vector<32x256xf32>
    %c0_25 = arith.constant 0 : index
    %c0_26 = arith.constant 0 : index
    %49 = vector.load %arg9[%c0_25, %c0_26] : memref<4x32xf32, #tpu.memory_space<vmem>>, vector<4x32xf32>
    %cst_27 = arith.constant dense<0.000000e+00> : vector<4x256xf32>
    %50 = tpu.matmul %49, %48, %cst_27 {dimension_numbers = #tpu.dot_dimension_numbers<[1], [0], [0], [1], [0, 0, 1, 1], [], []>} : vector<4x32xf32>, vector<32x256xf32>, vector<4x256xf32> -> vector<4x256xf32>
    %c0_28 = arith.constant 0 : index
    %c0_29 = arith.constant 0 : index
    %51 = vector.load %arg10[%c0_28, %c0_29] : memref<4x1xf32, #tpu.memory_space<vmem>>, vector<4x1xf32>
    %52 = vector.broadcast %51 : vector<4x1xf32> to vector<4x256xf32>
    %53 = arith.addf %50, %52 : vector<4x256xf32>
    %c0_30 = arith.constant 0 : index
    %c0_31 = arith.constant 0 : index
    %c0_32 = arith.constant 0 : index
    %54 = vector.load %arg11[%c0_30, %c0_31, %c0_32] : memref<1x4x256xf32, #tpu.memory_space<vmem>>, vector<1x4x256xf32>
    %55 = vector.shape_cast %54 : vector<1x4x256xf32> to vector<4x256xf32>
    %56 = vector.shape_cast %53 : vector<4x256xf32> to vector<1x4x256xf32>
    tpu.vector_store %arg11[%c0_30, %c0_31, %c0_32], %56 {strides = array<i32>} : memref<1x4x256xf32, #tpu.memory_space<vmem>>, vector<1x4x256xf32>,
    return
  }
  func.func @transform_0(%arg0: i32, %arg1: i32) -> (i32, i32) {
    %c0_i32 = arith.constant 0 : i32
    %c0_i32_0 = arith.constant 0 : i32
    %c0_i32_1 = arith.constant 0 : i32
    return %c0_i32, %c0_i32_0 : i32, i32
  }
  func.func @transform_1(%arg0: i32, %arg1: i32) -> (i32, i32, i32) {
    %c0_i32 = arith.constant 0 : i32
    %c0_i32_0 = arith.constant 0 : i32
    return %arg0, %c0_i32, %arg1 : i32, i32, i32
  }
  func.func @transform_2(%arg0: i32, %arg1: i32) -> (i32, i32, i32) {
    %c0_i32 = arith.constant 0 : i32
    %c0_i32_0 = arith.constant 0 : i32
    return %arg0, %c0_i32, %arg1 : i32, i32, i32
  }
  func.func @transform_3(%arg0: i32, %arg1: i32) -> (i32, i32, i32) {
    %c0_i32 = arith.constant 0 : i32
    %c0_i32_0 = arith.constant 0 : i32
    return %arg0, %c0_i32, %arg1 : i32, i32, i32
  }
  func.func @transform_4(%arg0: i32, %arg1: i32) -> (i32, i32, i32) {
    %c0_i32 = arith.constant 0 : i32
    %c0_i32_0 = arith.constant 0 : i32
    return %arg0, %c0_i32, %arg1 : i32, i32, i32
  }
  func.func @transform_5(%arg0: i32, %arg1: i32) -> (i32, i32, i32) {
    %c0_i32 = arith.constant 0 : i32
    %c0_i32_0 = arith.constant 0 : i32
    %c0_i32_1 = arith.constant 0 : i32
    return %arg0, %c0_i32, %c0_i32_0 : i32, i32, i32
  }
  func.func @transform_6(%arg0: i32, %arg1: i32) -> (i32, i32) {
    %c0_i32 = arith.constant 0 : i32
    %c0_i32_0 = arith.constant 0 : i32
    %c0_i32_1 = arith.constant 0 : i32
    return %c0_i32, %c0_i32_0 : i32, i32
  }
  func.func @transform_7(%arg0: i32, %arg1: i32) -> (i32, i32) {
    %c0_i32 = arith.constant 0 : i32
    %c0_i32_0 = arith.constant 0 : i32
    %c0_i32_1 = arith.constant 0 : i32
    return %c0_i32, %c0_i32_0 : i32, i32
  }
  func.func @transform_8(%arg0: i32, %arg1: i32) -> (i32, i32) {
    %c0_i32 = arith.constant 0 : i32
    %c0_i32_0 = arith.constant 0 : i32
    %c0_i32_1 = arith.constant 0 : i32
    return %c0_i32, %c0_i32_0 : i32, i32
  }
  func.func @transform_9(%arg0: i32, %arg1: i32) -> (i32, i32, i32) {
    %c0_i32 = arith.constant 0 : i32
    %c0_i32_0 = arith.constant 0 : i32
    return %arg0, %c0_i32, %arg1 : i32, i32, i32
  }
  func.func @transform_10(%arg0: i32, %arg1: i32) -> (i32, i32, i32) {
    %c0_i32 = arith.constant 0 : i32
    %c0_i32_0 = arith.constant 0 : i32
    return %arg0, %c0_i32, %arg1 : i32, i32, i32
  }
}

</mosaic_0001>

<bundles_post_ra>
// kernel: _lambda_.1
= control target key start
LH: loop header
LB: loop body
LE: loop exit
PB: predicated region body
PF: predicated region fallthrough
CT: control target
= control target key end

     0   :  { %s1497_s0 = inlined_call_operand.vmem [shape: f32[2,4], index: 0, kind: input, shape index: {}]   ;;  %s1498_s1 = inlined_call_operand.vmem [shape: f32[2,4,256], index: 1, kind: input, shape index: {}]   ;;  %s1499_s2 = inlined_call_operand.vmem [shape: f32[2,4,256], index: 2, kind: input, shape index: {}, may-alias: {2,10}]   ;;  %s1500_s3 = inlined_call_operand.vmem [shape: f32[2,4,256], index: 3, kind: input, shape index: {}]   ;;  %s1501_s4 = inlined_call_operand.vmem [shape: f32[2,4,256], index: 4, kind: input, shape index: {}]   ;;  %s1502_s5 = inlined_call_operand.vmem [shape: f32[2,32,1], index: 5, kind: input, shape index: {}]   ;;  %s1503_s6 = inlined_call_operand.vmem [shape: f32[32,8], index: 6, kind: input, shape index: {}]   ;;  %s1504_s7 = inlined_call_operand.vmem [shape: f32[4,32], index: 7, kind: input, shape index: {}]   ;;  %s1505_s8 = inlined_call_operand.vmem [shape: f32[4,1], index: 8, kind: input, shape index: {}]   ;;  %s1506_s9 = inlined_call_operand.vmem [shape: f32[2,4,256], index: 9, kind: output, shape index: {0}]   ;;  %s1507_s10 = inlined_call_operand.vmem [shape: f32[2,4,256], index: 10, kind: output, shape index: {1}, may-alias: {2,10}]  }
   0x1   :  { %1508 = sst [smem:[#allocation6_spill]] %s1497_s0 }
   0x2   :  { %1509 = sst [smem:[#allocation7_spill]] %s1503_s6 }
   0x3   :  { %16 = vsyncpa [#allocation3], 0  ;;  %s1348_s13 = smov 0   ;;  %s1350_s14 = smov 0  }
   0x4   :  { %s1352_s15 = smov 0  }
   0x5 LB: > { %s1160_s16 = sadd.s32 4294967295, %s1287_s15   ;;  %s34_s17 = sadd.s32 1, %s1283_s14  ;;  %s1287_s15 = sphi %s1352_s15, %s22_s15   ;;  %s1283_s14 = sphi %s1350_s14, %s1517_s14   ;;  %s1279_s13 = sphi %s1348_s13, %s1516_s13  }
   0x6   : > { %p36_p0 = scmp.ge.s32.totalorder %s34_s17, 2  ;;  %p1162_p1 = scmp.ge.s32.totalorder %s1287_s15, 1 }
   0x7   : > { %p317_p2 = scmp.lt.s32.totalorder %s1287_s15, 3  ;;  %p1373_p4 = scmp.eq.s32.totalorder %s1160_s16, 0 }
   0x8   : > { %s1519_s17 = smov (%p36_p0, %s34_s17), 0  ;;  %s1513_s0 = sld [smem:[#allocation6_spill]] }
   0x9   : > { %1510 = sst [smem:[#allocation5_spill]] %s1519_s17  ;;  %p1369_p3 = pnand %p1162_p1, %p317_p2 }
   0xb   : > { %p1209_p5 = pneg %p1369_p3 }
   0xd   : > { %p1210_p6 = pnand %p1373_p4, %p1209_p5 }
   0xe   : > { %s330_s22 = sshll.u32 %s1513_s0, 4  ;;  %s331_s22 = int_to_ptr.vmem [resolvable:$true] %s330_s22 }
   0xf   : > { %s1246_s23 = scalar_lea.vmem %s331_s22, 32  ;;  %p1248_p8 = pneg %p1210_p6 }
  0x10   : > { %p1247_p7 = scmp.ne.s32.totalorder %s331_s22, %s1246_s23  ;;  %p1254_p11 = scmp.lt.s32.totalorder %s331_s22, %s331_s22 }
  0x11   : > { %p1255_p12 = scmp.lt.s32.totalorder %s1246_s23, %s1246_s23 }
  0x12   : > { %p1249_p9 = pnand %p1248_p8, %p1247_p7 }
  0x13   : > { %p1256_p13 = por %p1255_p12, %p1254_p11 }
  0x14   : > { %p1250_p10 = pneg %p1249_p9 }
  0x16   : > { %p1257_p0 = pnand %p1256_p13, %p1250_p10 }
  0x18   : > { %1260 = shalt.err (!%p1257_p0)
}
  0x19   : > { %s1289_s24 = smov [#allocation2]   ;;  %412 = sbr.rel (%p1369_p3) target bundleno = 576 (0x240), region = 56 }
  0x1a   : > { %1212 = dma.vmem_to_smem (!%p1210_p6), %s331_s22, 32, %s1289_s24, [#allocation3]  }
  0x1e   : > { %1274 = dma.done.wait (%p1373_p4), [#allocation3], 32  }
  0x1f   : > { %1276 = vsyncadd (%p1373_p4), [#allocation3], 4294967264 }
  0x20   : > { %418 = sfence }
  0x21   : > { %s1514_s6 = sld [smem:[#allocation7_spill]]  ;;  %p501_p1 = scmp.lt.s32.totalorder %s1279_s13, 1  ;;  %v1291_v4 = vmov 0.0   ;;  %v1292_v5 = vmov 0   ;;  %vm621_vm0 = vcmask 1043456   ;;  %vm612_vm1 = vcmask 31744  }
  0x22   : > { %s1290_s29 = smov 124   ;;  %s1181_s30 = sshll.u32 %s1279_s13, 7  ;;  %793 = vmatprep.mubr.f32.mxu1 %v1291_v4  ;;  %690 = vmatprep.mubr.f32.mxu0 %v1291_v4  ;;  %v859_v28 = vld [vmem:[%s1505_s8] sm:$0xf]  ;;  %vm865_vm2 = vcmask 261120  }
  0x23   : > { %s1521_s13 = smov (!%p501_p1, %s1279_s13), 1  ;;  %s1419_s19 = sld [smem:[#allocation2 + %s1181_s30]]  ;;  %1243 = vset.pattern.permute.xlu0 %v1292_v5  ;;  %1244 = vset.pattern.permute.xlu1 %v1292_v5 }
  0x24   : > { %s567_s20 = sadd.s32 1, %s1181_s30  ;;  %s1422_s21 = sshll.u32 %s1521_s13, 3 }
  0x25   : > { %s1424_s22 = sld [smem:[#allocation2 + %s567_s20]]  ;;  %s508_s25 = scalar_lea.vmem %s1498_s1, %s1422_s21 }
  0x26   : > { %s518_s28 = scalar_lea.vmem %s1499_s2, %s1422_s21  ;;  %s528_s16 = scalar_lea.vmem %s1500_s3, %s1422_s21  ;;  %v573_v15 = vld [vmem:[%s508_s25] sm:$0xff] }
  0x27   : > { %v1393_v0 = vld [vmem:[%s1514_s6] sm:$0xff]  ;;  %v1398_v1 = vld [vmem:[%s1514_s6 + $0x10] sm:$0xff]  ;;  %v1407_v2 = vld [vmem:[%s1514_s6 + $0x8] sm:$0xff]  ;;  %s569_s18 = sadd.s32 2, %s1181_s30  ;;  %s571_s20 = sadd.s32 3, %s1181_s30 }
  0x28   : > { %602 = vrot.lane.b32.xlu0 %v1393_v0, %s1290_s29  ;;  %606 = vrot.lane.b32.xlu1 %v1398_v1, %s1290_s29  ;;  %v1412_v3 = vld [vmem:[%s1514_s6 + $0x18] sm:$0xff]  ;;  %v575_v6 = vld [vmem:[%s528_s16] sm:$0xff]  ;;  %s570_s0 = sld [smem:[#allocation2 + %s569_s18]]  ;;  %s538_s17 = scalar_lea.vmem %s1501_s4, %s1422_s21 }
  0x29   : > { %v577_v7 = vmul.f32 2.0, %v575_v6  ;;  %s572_s23 = sld [smem:[#allocation2 + %s571_s20]]  ;;  %v579_v8 = vstv %s1419_s19  ;;  %v576_v9 = vld [vmem:[%s538_s17] sm:$0xff]  ;;  %s1202_s24 = sshll.u32 %s1521_s13, 5 }
  0x2a   : > { %v611_v11 = vcombine.high %v576_v9, %v576_v9  ;;  %s544_s11 = scalar_lea.vmem %s1502_s5, %s1202_s24  ;;  %v574_v12 = vld [vmem:[%s518_s28] sm:$0xff]  ;;  %s563_s13 = scalar_lea.vmem %s1507_s10, %s1422_s21 }
  0x2b   : > { %v1182_v10 = vadd.f32 -1.0, %v577_v7  ;;  %s589_s30 = ssub.f32 1.0, %s1424_s22  ;;  %v821_v13 = vld [vmem:[%s544_s11 + $0x18] sm:$0xff]  ;;  %v820_v14 = vld [vmem:[%s544_s11 + $0x10] sm:$0xff]  ;;  %v818_v17 = vld [vmem:[%s544_s11] sm:$0xff]  ;;  %v587_v25 = vstv %s1424_s22  ;;  %s553_s16 = scalar_lea.vmem %s1506_s9, %s1422_s21 }
  0x2c   : > { %604 = vrot.lane.b32.xlu0 %v1407_v2, %s1290_s29  ;;  %608 = vrot.lane.b32.xlu1 %v1412_v3, %s1290_s29  ;;  %v819_v20 = vld [vmem:[%s544_s11 + $0x8] sm:$0xff] }
  0x2d   : > { %v580_v16 = vmul.f32 %v1182_v10, %v579_v8  ;;  %1183 = vmatprep.subr.msk.mxu0 %vm621_vm0, %v611_v11  ;;  %v590_v23 = vstv %s589_s30 }
  0x2e   : > { %1184 = vmatpush1.msk.msra.mxu0 %vm621_vm0, %v576_v9  ;;  %v582_v19 = vstv %s570_s0  ;;  %v591_v27 = vmul.f32 %v590_v23, %v573_v15 }
  0x2f   : > { %v581_v18 = vadd.f32 %v580_v16, %v574_v12  ;;  %v583_v21 = vmul.f32 %v582_v19, %v573_v15  ;;  %v584_v22 = vstv %s572_s23  ;;  %v858_v16 = vld [vmem:[%s1504_s7] sm:$0xf] }
  0x30   : > { %839 = vperm.xlu0 %1243, %v821_v13   ;;  %834 = vperm.xlu1 %1244, %v820_v14  }
  0x31   : > { %v585_v24 = vmul.f32 %v584_v22, %v581_v18  ;;  %593 = vst [vmem:[%s563_s13] sm:$0xff] %v581_v18 }
  0x33   : > { %v586_v26 = vadd.f32 %v585_v24, %v583_v21 }
  0x34   : > { %824 = vperm.xlu0 %1243, %v818_v17   ;;  %829 = vperm.xlu1 %1244, %v819_v20  }
  0x35   : > { %v588_v29 = vmul.f32 %v587_v25, %v586_v26 }
  0x37   : > { %v592_v30 = vadd.f32 %v591_v27, %v588_v29 }
  0x38   : > { %862 = vperm.xlu1 %1244, %v859_v28  }
  0x39   : > { %v716_v31 = vcombine.high %v592_v30, %v592_v30 }
  0x3b   : > { %1189 = vmatprep.subr.msk.mxu1 %vm621_vm0, %v716_v31 }
  0x3c   : > { %1190 = vmatpush1.msk.msra.mxu1 %vm621_vm0, %v592_v30 }
  0x3d   : > { %1191 = vmatmul.mubr.msk.f32.vlgmr.msra.gmra.mxu1 %vm612_vm1, %v1393_v0 }
  0x3e   : > { %799 = vmatprep.mubr.f32.mxu1 %v1291_v4 }
  0x41   : > { %1192 = vmatmul.mubr.msk.f32.gmra.mxu1 %vm612_vm1, %v1407_v2 }
  0x42   : > { %805 = vmatprep.mubr.f32.mxu1 %v1291_v4 }
  0x45   : > { %1193 = vmatmul.mubr.msk.f32.gmra.mxu1 %vm612_vm1, %v1398_v1 }
  0x46   : > { %811 = vmatprep.mubr.f32.mxu1 %v1291_v4 }
  0x49   : > { %1194 = vmatmul.mubr.msk.f32.gmra.mxu1 %vm612_vm1, %v1412_v3 }
  0x9a   : > { %v603_v32 = vpop.permute.xlu0 %602  ;;  %v607_v34 = vpop.permute.xlu1 %606 }
  0x9b   : > { %1185 = vmatmul.mubr.msk.f32.vlgmr.msra.gmra.mxu0 %vm612_vm1, %v603_v32 }
  0x9c   : > { %696 = vmatprep.mubr.f32.mxu0 %v1291_v4 }
  0x9e   : > { %v605_v33 = vpop.permute.xlu0 %604  ;;  %v609_v35 = vpop.permute.xlu1 %608 }
  0x9f   : > { %1186 = vmatmul.mubr.msk.f32.gmra.mxu0 %vm612_vm1, %v605_v33 }
  0xa0   : > { %702 = vmatprep.mubr.f32.mxu0 %v1291_v4 }
  0xa3   : > { %1187 = vmatmul.mubr.msk.f32.gmra.mxu0 %vm612_vm1, %v607_v34 }
  0xa4   : > { %708 = vmatprep.mubr.f32.mxu0 %v1291_v4 }
  0xa7   : > { %1188 = vmatmul.mubr.msk.f32.gmra.mxu0 %vm612_vm1, %v609_v35 }
  0xa8   : > { %933 = vmatprep.mubr.f32.mxu0 %v1291_v4 }
  0xab   : > { %v835_v49 = vpop.permute.xlu1 %834  ;;  %v840_v51 = vpop.permute.xlu0 %839 }
  0xaf   : > { %v830_v62 = vpop.permute.xlu1 %829  ;;  %v825_v3 = vpop.permute.xlu0 %824 }
  0xb3   : > { %v863_v18 = vpop.permute.xlu1 %862 }
  0xfd   : > { %v795_v36 = vpop.f32.mrf.mxu1 }
  0xff   : > { %v797_v37 = vpop.f32.mrf.mxu1 }
 0x101   : > { %v801_v38 = vpop.f32.mrf.mxu1 }
 0x103   : > { %v803_v39 = vpop.f32.mrf.mxu1 }
 0x105   : > { %v807_v42 = vpop.f32.mrf.mxu1 }
 0x107   : > { %v809_v45 = vpop.f32.mrf.mxu1 }
 0x109   : > { %v813_v48 = vpop.f32.mrf.mxu1 }
 0x10b   : > { %v815_v55 = vpop.f32.mrf.mxu1 }
 0x15b   : > { %v692_v40 = vpop.f32.mrf.mxu0 }
 0x15c   : > { %v796_v1 = vadd.f32 %v795_v36, %v692_v40 }
 0x15d   : > { %v694_v41 = vpop.f32.mrf.mxu0 }
 0x15e   : > { %v798_v61 = vadd.f32 %v797_v37, %v694_v41  ;;  %v842_v10 = vadd.f32 %v825_v3, %v796_v1 }
 0x15f   : > { %v698_v43 = vpop.f32.mrf.mxu0 }
 0x160   : > { %v802_v59 = vadd.f32 %v801_v38, %v698_v43  ;;  %v843_v8 = vadd.f32 %v825_v3, %v798_v61  ;;  %v850_v15 = vmax.f32 %v842_v10, 0.0 }
 0x161   : > { %v700_v44 = vpop.f32.mrf.mxu0 }
 0x162   : > { %v804_v57 = vadd.f32 %v803_v39, %v700_v44  ;;  %v844_v6 = vadd.f32 %v830_v62, %v802_v59  ;;  %v851_v14 = vmax.f32 %v843_v8, 0.0 }
 0x163   : > { %v704_v46 = vpop.f32.mrf.mxu0 }
 0x164   : > { %v808_v54 = vadd.f32 %v807_v42, %v704_v46  ;;  %v845_v4 = vadd.f32 %v830_v62, %v804_v57  ;;  %v852_v13 = vmax.f32 %v844_v6, 0.0 }
 0x165   : > { %v706_v47 = vpop.f32.mrf.mxu0 }
 0x166   : > { %v810_v52 = vadd.f32 %v809_v45, %v706_v47  ;;  %v846_v2 = vadd.f32 %v835_v49, %v808_v54  ;;  %v853_v12 = vmax.f32 %v845_v4, 0.0 }
 0x167   : > { %v710_v50 = vpop.f32.mrf.mxu0 }
 0x168   : > { %v814_v53 = vadd.f32 %v813_v48, %v710_v50  ;;  %v847_v63 = vadd.f32 %v835_v49, %v810_v52  ;;  %v854_v11 = vmax.f32 %v846_v2, 0.0 }
 0x169   : > { %v712_v56 = vpop.f32.mrf.mxu0 }
 0x16a   : > { %v816_v58 = vadd.f32 %v815_v55, %v712_v56  ;;  %v848_v60 = vadd.f32 %v840_v51, %v814_v53  ;;  %v855_v9 = vmax.f32 %v847_v63, 0.0 }
 0x16c   : > { %v849_v0 = vadd.f32 %v840_v51, %v816_v58  ;;  %v856_v7 = vmax.f32 %v848_v60, 0.0 }
 0x16e   : > { %v857_v5 = vmax.f32 %v849_v0, 0.0 }
 0x170   : > { %893 = vmatprep.subr.mxu0 %v857_v5 }
 0x171   : > { %894 = vmatpush1.msra.mxu0 %v856_v7 }
 0x172   : > { %895 = vmatprep.subr.mxu0 %v855_v9 }
 0x173   : > { %896 = vmatpush1.msra.mxu0 %v854_v11 }
 0x174   : > { %897 = vmatprep.subr.mxu0 %v853_v12 }
 0x175   : > { %898 = vmatpush1.msra.mxu0 %v852_v13 }
 0x176   : > { %899 = vmatprep.subr.mxu0 %v851_v14 }
 0x177   : > { %900 = vmatpush1.msra.mxu0 %v850_v15 }
 0x178   : > { %1195 = vmatmul.mubr.msk.f32.vlgmr.msra.gmra.mxu0 %vm865_vm2, %v858_v16 }
 0x238   : > { %v935_v17 = vpop.f32.mrf.mxu0 }
 0x239   : > { %v936_v20 = vadd.f32 %v935_v17, %v863_v18 }
 0x23a   : > { %v937_v19 = vpop.f32.mrf.mxu0 }
 0x23b   : > { %v938_v21 = vadd.f32 %v937_v19, %v863_v18 }
 0x23d   : > { %v942_v22 = vcombine.low %v936_v20, %v938_v21 }
 0x23f   : > { %944 = vst [vmem:[%s553_s16] sm:$0xff] %v942_v22 }
 0x240 PF: > { %s22_s15 = sadd.s32 1, %s1287_s15   ;;  %s1515_s18 = sld [smem:[#allocation5_spill]] }
 0x241   : > { %p19_p2 = scmp.ge.s32.totalorder %s22_s15, 4   ;;  %s1516_s13 = smov %s1283_s14 }
 0x243   :  { %21 = sbr.rel (!%p19_p2) target bundleno = 5 (0x5), region = 115 }
 0x246   : > { %s1517_s14 = smov %s1515_s18 }
 0x248   :  { %1000 = vsyncpa [#allocation3], 1 }
 0x249   :  { %1002 = vsyncpa [#allocation3 + $0x1], 1 }

</bundles_post_ra>
